<compile_context>
chip_gen: v5e
topology: v5e:2x2
jax: 0.10.0
libtpu: 0.0.40
codegen_flags: <defaults>
</compile_context>

<pallas_src>
import jax
import jax.numpy as jnp
from jax import lax
from jax.experimental import pallas as pl
from jax.experimental.pallas import tpu as pltpu


def lstm_kernel(x_ref, w_ih_ref, w_hh_ref, b_ref, w_lin_ref, b_lin_ref,
                out_ref, xg_scr, hs_scr):
    """Full LSTM + output-linear forward in one kernel invocation.

    Refs:
      x_ref     : (S, I)      input sequence
      w_ih_ref  : (I, 4H)     input->gates weights (transposed PyTorch W_ih)
      w_hh_ref  : (H, 4H)     hidden->gates weights (transposed PyTorch W_hh)
      b_ref     : (1, 4H)     b_ih + b_hh
      w_lin_ref : (H, Opad)   output linear weight (transposed, lane-padded)
      b_lin_ref : (1, Opad)   output linear bias (lane-padded)
      out_ref   : (S, Opad)   per-timestep logits (lane-dense)
      xg_scr    : (S, 4H)     VMEM scratch: precomputed input projections
      hs_scr    : (S, H)      VMEM scratch: per-timestep hidden states
    """
    S = x_ref.shape[0]
    H = w_hh_ref.shape[0]

    # One MXU pass for ALL input projections — off the recurrence chain.
    xg_scr[...] = (
        jnp.dot(x_ref[...], w_ih_ref[...], preferred_element_type=jnp.float32)
        + b_ref[...]
    )

    # Hoist W_hh into vregs once: (32, 128) f32 = 4 vregs, ample headroom.
    w_hh = w_hh_ref[...]

    # Initial (hidden, cell) are zeros, as in the PyTorch module's __init__.
    h0 = jnp.zeros((1, H), jnp.float32)
    c0 = jnp.zeros((1, H), jnp.float32)

    def step(t, carry):
        h, c = carry                                              # vreg-resident
        # gates = x_t @ W_ih^T + b + h @ W_hh^T   -> (1, 4H) = one 128-lane vreg
        gates = xg_scr[pl.ds(t, 1), :] + jnp.dot(
            h, w_hh, preferred_element_type=jnp.float32)
        # Two EUP passes over the full gates vreg instead of four masked
        # 32-lane ones; the 32-lane alignment slices go to the XLU.
        sig = jax.nn.sigmoid(gates)
        th = jnp.tanh(gates)
        i = sig[:, 0 * H:1 * H]
        f = sig[:, 1 * H:2 * H]
        g = th[:, 2 * H:3 * H]
        o = sig[:, 3 * H:4 * H]
        c_new = f * c + i * g
        h_new = o * jnp.tanh(c_new)
        hs_scr[pl.ds(t, 1), :] = h_new        # only per-step VMEM traffic
        return (h_new, c_new)

    # Serial recurrence: state carried in vregs, fully unrolled so the
    # scheduler sees across iterations.
    lax.fori_loop(0, S, step, (h0, c0), unroll=True)

    # Single post-loop output projection (nn.Linear) — lane-dense store.
    out_ref[...] = (
        jnp.dot(hs_scr[...], w_lin_ref[...],
                preferred_element_type=jnp.float32)
        + b_lin_ref[...]
    ).astype(out_ref.dtype)


def lstm_forward(x, w_ih_t, w_hh_t, b, w_lin_t, b_lin):
    S, I = x.shape
    H = w_hh_t.shape[0]
    O = w_lin_t.shape[1]

    # Lane-dense output: zero-pad the linear layer's output dim to a full
    # 128-lane width so the in-kernel store is an unmasked vst; the real
    # columns are sliced back off in plain JAX below.
    LANE = 128
    O_pad = ((O + LANE - 1) // LANE) * LANE
    w_lin_pad = jnp.zeros((H, O_pad), jnp.float32).at[:, :O].set(w_lin_t)
    b_lin_pad = jnp.zeros((1, O_pad), jnp.float32).at[:, :O].set(b_lin)

    vmem = pl.BlockSpec(memory_space=pltpu.MemorySpace.VMEM)

    # TODO(synk): at production sizes (large S / H), tile xg_scr and hs_scr
    # over S chunks (grid axis or emit_pipeline) and re-budget VMEM for v5e's
    # 16 MiB scoped default / v7x's 64 MiB physical VMEM; with batch > 1 or
    # bidirectional layers, add a leading "parallel" grid axis so the second
    # v7x TensorCore gets work and batch lands on the MXU M dimension.
    out_pad = pl.pallas_call(
        lstm_kernel,
        out_shape=jax.ShapeDtypeStruct((S, O_pad), jnp.float32),
        in_specs=[vmem] * 6,
        out_specs=vmem,
        scratch_shapes=[
            pltpu.VMEM((S, 4 * H), jnp.float32),  # x @ W_ih^T + b
            pltpu.VMEM((S, H), jnp.float32),      # per-step hidden states
        ],
    )(x, w_ih_t, w_hh_t, b, w_lin_pad, b_lin_pad)

    return out_pad[:, :O]


def lstm_reference(x, w_ih_t, w_hh_t, b, w_lin_t, b_lin):
    """Pure-JAX reference (mirrors torch.nn.LSTM + nn.Linear, batch=1)."""
    H = w_hh_t.shape[0]

    def step(carry, x_t):
        h, c = carry
        gates = x_t @ w_ih_t + h @ w_hh_t + b[0]
        i = jax.nn.sigmoid(gates[0 * H:1 * H])
        f = jax.nn.sigmoid(gates[1 * H:2 * H])
        g = jnp.tanh(gates[2 * H:3 * H])
        o = jax.nn.sigmoid(gates[3 * H:4 * H])
        c_new = f * c + i * g
        h_new = o * jnp.tanh(c_new)
        return (h_new, c_new), h_new

    h0 = jnp.zeros((H,), jnp.float32)
    c0 = jnp.zeros((H,), jnp.float32)
    _, hs = lax.scan(step, (h0, c0), x)
    return hs @ w_lin_t + b_lin[0]


if __name__ == "__main__":
    SEQ_LEN, IN_SIZE, HIDDEN_SIZE, OUT_SIZE = 8, 16, 32, 8

    key = jax.random.PRNGKey(0)
    k_x, k_wih, k_whh, k_bih, k_bhh, k_wl, k_bl = jax.random.split(key, 7)

    scale = 1.0 / jnp.sqrt(HIDDEN_SIZE)

    x = jax.random.normal(k_x, (SEQ_LEN, IN_SIZE), jnp.float32)

    # PyTorch nn.LSTM params: W_ih (4H, I), W_hh (4H, H), b_ih/b_hh (4H,)
    w_ih = jax.random.uniform(k_wih, (4 * HIDDEN_SIZE, IN_SIZE),
                              jnp.float32, -scale, scale)
    w_hh = jax.random.uniform(k_whh, (4 * HIDDEN_SIZE, HIDDEN_SIZE),
                              jnp.float32, -scale, scale)
    b_ih = jax.random.uniform(k_bih, (4 * HIDDEN_SIZE,),
                              jnp.float32, -scale, scale)
    b_hh = jax.random.uniform(k_bhh, (4 * HIDDEN_SIZE,),
                              jnp.float32, -scale, scale)
    # nn.Linear params: W (O, H), b (O,)
    w_lin = jax.random.uniform(k_wl, (OUT_SIZE, HIDDEN_SIZE),
                               jnp.float32, -scale, scale)
    b_lin = jax.random.uniform(k_bl, (OUT_SIZE,),
                               jnp.float32, -scale, scale)

    # Pre-transpose / combine outside the kernel (glue).
    w_ih_t = w_ih.T                       # (I, 4H)
    w_hh_t = w_hh.T                       # (H, 4H)
    b_comb = (b_ih + b_hh)[None, :]       # (1, 4H)
    w_lin_t = w_lin.T                     # (H, O)
    b_lin2 = b_lin[None, :]               # (1, O)

    out = lstm_forward(x, w_ih_t, w_hh_t, b_comb, w_lin_t, b_lin2)
    out = jax.block_until_ready(out)

    ref = lstm_reference(x, w_ih_t, w_hh_t, b_comb, w_lin_t, b_lin2)
    assert out.shape == (SEQ_LEN, OUT_SIZE)
    assert jnp.allclose(out, ref, atol=1e-5, rtol=1e-5)

    # TODO(synk): bidirectional / multi-layer / dropout variants of nn.LSTM are
    # not exercised (module is instantiated as 1-layer unidirectional here).

    print("KERNEL_OK")
</pallas_src>

<mosaic_0001>
module attributes {stable_mosaic.version = 11 : i64} {
  func.func @lstm_kernel(%arg0: memref<8x16xf32, #tpu.memory_space<vmem>>, %arg1: memref<16x128xf32, #tpu.memory_space<vmem>>, %arg2: memref<32x128xf32, #tpu.memory_space<vmem>>, %arg3: memref<1x128xf32, #tpu.memory_space<vmem>>, %arg4: memref<32x128xf32, #tpu.memory_space<vmem>>, %arg5: memref<1x128xf32, #tpu.memory_space<vmem>>, %arg6: memref<8x128xf32, #tpu.memory_space<vmem>>, %arg7: memref<8x128xf32, #tpu.memory_space<vmem>>, %arg8: memref<8x32xf32, #tpu.memory_space<vmem>>) attributes {dimension_semantics = [], scalar_prefetch = 0 : i64, scratch_operands = 2 : i64, tpu.core_type = #tpu.core_type<tc>} {
    %c0 = arith.constant 0 : index
    %c0_0 = arith.constant 0 : index
    %0 = vector.load %arg0[%c0, %c0_0] : memref<8x16xf32, #tpu.memory_space<vmem>>, vector<8x16xf32>
    %c0_1 = arith.constant 0 : index
    %c0_2 = arith.constant 0 : index
    %1 = vector.load %arg1[%c0_1, %c0_2] : memref<16x128xf32, #tpu.memory_space<vmem>>, vector<16x128xf32>
    %cst = arith.constant dense<0.000000e+00> : vector<8x128xf32>
    %2 = tpu.matmul %0, %1, %cst {dimension_numbers = #tpu.dot_dimension_numbers<[1], [0], [0], [1], [0, 0, 1, 1], [], []>} : vector<8x16xf32>, vector<16x128xf32>, vector<8x128xf32> -> vector<8x128xf32>
    %c0_3 = arith.constant 0 : index
    %c0_4 = arith.constant 0 : index
    %3 = vector.load %arg3[%c0_3, %c0_4] : memref<1x128xf32, #tpu.memory_space<vmem>>, vector<1x128xf32>
    %4 = vector.broadcast %3 : vector<1x128xf32> to vector<8x128xf32>
    %5 = arith.addf %2, %4 : vector<8x128xf32>
    %c0_5 = arith.constant 0 : index
    %c0_6 = arith.constant 0 : index
    %6 = vector.load %arg7[%c0_5, %c0_6] : memref<8x128xf32, #tpu.memory_space<vmem>>, vector<8x128xf32>
    tpu.vector_store %arg7[%c0_5, %c0_6], %5 {strides = array<i32>} : memref<8x128xf32, #tpu.memory_space<vmem>>, vector<8x128xf32>,
    %c0_7 = arith.constant 0 : index
    %c0_8 = arith.constant 0 : index
    %7 = vector.load %arg2[%c0_7, %c0_8] : memref<32x128xf32, #tpu.memory_space<vmem>>, vector<32x128xf32>
    %cst_9 = arith.constant 0.000000e+00 : f32
    %8 = vector.broadcast %cst_9 : f32 to vector<1x32xf32>
    %cst_10 = arith.constant 0.000000e+00 : f32
    %9 = vector.broadcast %cst_10 : f32 to vector<1x32xf32>
    %c0_i32 = arith.constant 0 : i32
    %10 = arith.index_cast %c0_i32 : i32 to index
    %c0_11 = arith.constant 0 : index
    %11 = vector.load %arg7[%10, %c0_11] : memref<8x128xf32, #tpu.memory_space<vmem>>, vector<1x128xf32>
    %cst_12 = arith.constant dense<0.000000e+00> : vector<1x128xf32>
    %12 = tpu.matmul %8, %7, %cst_12 {dimension_numbers = #tpu.dot_dimension_numbers<[1], [0], [0], [1], [0, 0, 1, 1], [], []>} : vector<1x32xf32>, vector<32x128xf32>, vector<1x128xf32> -> vector<1x128xf32>
    %13 = arith.addf %11, %12 : vector<1x128xf32>
    %14 = arith.negf %13 : vector<1x128xf32>
    %15 = math.exp %14 : vector<1x128xf32>
    %cst_13 = arith.constant 1.000000e+00 : f32
    %16 = vector.broadcast %cst_13 : f32 to vector<1x128xf32>
    %17 = arith.addf %16, %15 : vector<1x128xf32>
    %18 = arith.divf %16, %17 : vector<1x128xf32>
    %19 = math.tanh %13 : vector<1x128xf32>
    %20 = vector.extract_strided_slice %18 {offsets = [0, 0], sizes = [1, 32], strides = [1, 1]} : vector<1x128xf32> to vector<1x32xf32>
    %21 = vector.extract_strided_slice %18 {offsets = [0, 32], sizes = [1, 32], strides = [1, 1]} : vector<1x128xf32> to vector<1x32xf32>
    %22 = vector.extract_strided_slice %19 {offsets = [0, 64], sizes = [1, 32], strides = [1, 1]} : vector<1x128xf32> to vector<1x32xf32>
    %23 = vector.extract_strided_slice %18 {offsets = [0, 96], sizes = [1, 32], strides = [1, 1]} : vector<1x128xf32> to vector<1x32xf32>
    %24 = arith.mulf %21, %9 : vector<1x32xf32>
    %25 = arith.mulf %20, %22 : vector<1x32xf32>
    %26 = arith.addf %24, %25 : vector<1x32xf32>
    %27 = math.tanh %26 : vector<1x32xf32>
    %28 = arith.mulf %23, %27 : vector<1x32xf32>
    %29 = arith.index_cast %c0_i32 : i32 to index
    %c0_14 = arith.constant 0 : index
    %30 = vector.load %arg8[%29, %c0_14] : memref<8x32xf32, #tpu.memory_space<vmem>>, vector<1x32xf32>
    tpu.vector_store %arg8[%29, %c0_14], %28 {strides = array<i32>} : memref<8x32xf32, #tpu.memory_space<vmem>>, vector<1x32xf32>,
    %c1_i32 = arith.constant 1 : i32
    %31 = arith.index_cast %c1_i32 : i32 to index
    %c0_15 = arith.constant 0 : index
    %32 = vector.load %arg7[%31, %c0_15] : memref<8x128xf32, #tpu.memory_space<vmem>>, vector<1x128xf32>
    %cst_16 = arith.constant dense<0.000000e+00> : vector<1x128xf32>
    %33 = tpu.matmul %28, %7, %cst_16 {dimension_numbers = #tpu.dot_dimension_numbers<[1], [0], [0], [1], [0, 0, 1, 1], [], []>} : vector<1x32xf32>, vector<32x128xf32>, vector<1x128xf32> -> vector<1x128xf32>
    %34 = arith.addf %32, %33 : vector<1x128xf32>
    %35 = arith.negf %34 : vector<1x128xf32>
    %36 = math.exp %35 : vector<1x128xf32>
    %cst_17 = arith.constant 1.000000e+00 : f32
    %37 = vector.broadcast %cst_17 : f32 to vector<1x128xf32>
    %38 = arith.addf %37, %36 : vector<1x128xf32>
    %39 = arith.divf %37, %38 : vector<1x128xf32>
    %40 = math.tanh %34 : vector<1x128xf32>
    %41 = vector.extract_strided_slice %39 {offsets = [0, 0], sizes = [1, 32], strides = [1, 1]} : vector<1x128xf32> to vector<1x32xf32>
    %42 = vector.extract_strided_slice %39 {offsets = [0, 32], sizes = [1, 32], strides = [1, 1]} : vector<1x128xf32> to vector<1x32xf32>
    %43 = vector.extract_strided_slice %40 {offsets = [0, 64], sizes = [1, 32], strides = [1, 1]} : vector<1x128xf32> to vector<1x32xf32>
    %44 = vector.extract_strided_slice %39 {offsets = [0, 96], sizes = [1, 32], strides = [1, 1]} : vector<1x128xf32> to vector<1x32xf32>
    %45 = arith.mulf %42, %26 : vector<1x32xf32>
    %46 = arith.mulf %41, %43 : vector<1x32xf32>
    %47 = arith.addf %45, %46 : vector<1x32xf32>
    %48 = math.tanh %47 : vector<1x32xf32>
    %49 = arith.mulf %44, %48 : vector<1x32xf32>
    %50 = arith.index_cast %c1_i32 : i32 to index
    %c0_18 = arith.constant 0 : index
    %51 = vector.load %arg8[%50, %c0_18] : memref<8x32xf32, #tpu.memory_space<vmem>>, vector<1x32xf32>
    tpu.vector_store %arg8[%50, %c0_18], %49 {strides = array<i32>} : memref<8x32xf32, #tpu.memory_space<vmem>>, vector<1x32xf32>,
    %c2_i32 = arith.constant 2 : i32
    %52 = arith.index_cast %c2_i32 : i32 to index
    %c0_19 = arith.constant 0 : index
    %53 = vector.load %arg7[%52, %c0_19] : memref<8x128xf32, #tpu.memory_space<vmem>>, vector<1x128xf32>
    %cst_20 = arith.constant dense<0.000000e+00> : vector<1x128xf32>
    %54 = tpu.matmul %49, %7, %cst_20 {dimension_numbers = #tpu.dot_dimension_numbers<[1], [0], [0], [1], [0, 0, 1, 1], [], []>} : vector<1x32xf32>, vector<32x128xf32>, vector<1x128xf32> -> vector<1x128xf32>
    %55 = arith.addf %53, %54 : vector<1x128xf32>
    %56 = arith.negf %55 : vector<1x128xf32>
    %57 = math.exp %56 : vector<1x128xf32>
    %cst_21 = arith.constant 1.000000e+00 : f32
    %58 = vector.broadcast %cst_21 : f32 to vector<1x128xf32>
    %59 = arith.addf %58, %57 : vector<1x128xf32>
    %60 = arith.divf %58, %59 : vector<1x128xf32>
    %61 = math.tanh %55 : vector<1x128xf32>
    %62 = vector.extract_strided_slice %60 {offsets = [0, 0], sizes = [1, 32], strides = [1, 1]} : vector<1x128xf32> to vector<1x32xf32>
    %63 = vector.extract_strided_slice %60 {offsets = [0, 32], sizes = [1, 32], strides = [1, 1]} : vector<1x128xf32> to vector<1x32xf32>
    %64 = vector.extract_strided_slice %61 {offsets = [0, 64], sizes = [1, 32], strides = [1, 1]} : vector<1x128xf32> to vector<1x32xf32>
    %65 = vector.extract_strided_slice %60 {offsets = [0, 96], sizes = [1, 32], strides = [1, 1]} : vector<1x128xf32> to vector<1x32xf32>
    %66 = arith.mulf %63, %47 : vector<1x32xf32>
    %67 = arith.mulf %62, %64 : vector<1x32xf32>
    %68 = arith.addf %66, %67 : vector<1x32xf32>
    %69 = math.tanh %68 : vector<1x32xf32>
    %70 = arith.mulf %65, %69 : vector<1x32xf32>
    %71 = arith.index_cast %c2_i32 : i32 to index
    %c0_22 = arith.constant 0 : index
    %72 = vector.load %arg8[%71, %c0_22] : memref<8x32xf32, #tpu.memory_space<vmem>>, vector<1x32xf32>
    tpu.vector_store %arg8[%71, %c0_22], %70 {strides = array<i32>} : memref<8x32xf32, #tpu.memory_space<vmem>>, vector<1x32xf32>,
    %c3_i32 = arith.constant 3 : i32
    %73 = arith.index_cast %c3_i32 : i32 to index
    %c0_23 = arith.constant 0 : index
    %74 = vector.load %arg7[%73, %c0_23] : memref<8x128xf32, #tpu.memory_space<vmem>>, vector<1x128xf32>
    %cst_24 = arith.constant dense<0.000000e+00> : vector<1x128xf32>
    %75 = tpu.matmul %70, %7, %cst_24 {dimension_numbers = #tpu.dot_dimension_numbers<[1], [0], [0], [1], [0, 0, 1, 1], [], []>} : vector<1x32xf32>, vector<32x128xf32>, vector<1x128xf32> -> vector<1x128xf32>
    %76 = arith.addf %74, %75 : vector<1x128xf32>
    %77 = arith.negf %76 : vector<1x128xf32>
    %78 = math.exp %77 : vector<1x128xf32>
    %cst_25 = arith.constant 1.000000e+00 : f32
    %79 = vector.broadcast %cst_25 : f32 to vector<1x128xf32>
    %80 = arith.addf %79, %78 : vector<1x128xf32>
    %81 = arith.divf %79, %80 : vector<1x128xf32>
    %82 = math.tanh %76 : vector<1x128xf32>
    %83 = vector.extract_strided_slice %81 {offsets = [0, 0], sizes = [1, 32], strides = [1, 1]} : vector<1x128xf32> to vector<1x32xf32>
    %84 = vector.extract_strided_slice %81 {offsets = [0, 32], sizes = [1, 32], strides = [1, 1]} : vector<1x128xf32> to vector<1x32xf32>
    %85 = vector.extract_strided_slice %82 {offsets = [0, 64], sizes = [1, 32], strides = [1, 1]} : vector<1x128xf32> to vector<1x32xf32>
    %86 = vector.extract_strided_slice %81 {offsets = [0, 96], sizes = [1, 32], strides = [1, 1]} : vector<1x128xf32> to vector<1x32xf32>
    %87 = arith.mulf %84, %68 : vector<1x32xf32>
    %88 = arith.mulf %83, %85 : vector<1x32xf32>
    %89 = arith.addf %87, %88 : vector<1x32xf32>
    %90 = math.tanh %89 : vector<1x32xf32>
    %91 = arith.mulf %86, %90 : vector<1x32xf32>
    %92 = arith.index_cast %c3_i32 : i32 to index
    %c0_26 = arith.constant 0 : index
    %93 = vector.load %arg8[%92, %c0_26] : memref<8x32xf32, #tpu.memory_space<vmem>>, vector<1x32xf32>
    tpu.vector_store %arg8[%92, %c0_26], %91 {strides = array<i32>} : memref<8x32xf32, #tpu.memory_space<vmem>>, vector<1x32xf32>,
    %c4_i32 = arith.constant 4 : i32
    %94 = arith.index_cast %c4_i32 : i32 to index
    %c0_27 = arith.constant 0 : index
    %95 = vector.load %arg7[%94, %c0_27] : memref<8x128xf32, #tpu.memory_space<vmem>>, vector<1x128xf32>
    %cst_28 = arith.constant dense<0.000000e+00> : vector<1x128xf32>
    %96 = tpu.matmul %91, %7, %cst_28 {dimension_numbers = #tpu.dot_dimension_numbers<[1], [0], [0], [1], [0, 0, 1, 1], [], []>} : vector<1x32xf32>, vector<32x128xf32>, vector<1x128xf32> -> vector<1x128xf32>
    %97 = arith.addf %95, %96 : vector<1x128xf32>
    %98 = arith.negf %97 : vector<1x128xf32>
    %99 = math.exp %98 : vector<1x128xf32>
    %cst_29 = arith.constant 1.000000e+00 : f32
    %100 = vector.broadcast %cst_29 : f32 to vector<1x128xf32>
    %101 = arith.addf %100, %99 : vector<1x128xf32>
    %102 = arith.divf %100, %101 : vector<1x128xf32>
    %103 = math.tanh %97 : vector<1x128xf32>
    %104 = vector.extract_strided_slice %102 {offsets = [0, 0], sizes = [1, 32], strides = [1, 1]} : vector<1x128xf32> to vector<1x32xf32>
    %105 = vector.extract_strided_slice %102 {offsets = [0, 32], sizes = [1, 32], strides = [1, 1]} : vector<1x128xf32> to vector<1x32xf32>
    %106 = vector.extract_strided_slice %103 {offsets = [0, 64], sizes = [1, 32], strides = [1, 1]} : vector<1x128xf32> to vector<1x32xf32>
    %107 = vector.extract_strided_slice %102 {offsets = [0, 96], sizes = [1, 32], strides = [1, 1]} : vector<1x128xf32> to vector<1x32xf32>
    %108 = arith.mulf %105, %89 : vector<1x32xf32>
    %109 = arith.mulf %104, %106 : vector<1x32xf32>
    %110 = arith.addf %108, %109 : vector<1x32xf32>
    %111 = math.tanh %110 : vector<1x32xf32>
    %112 = arith.mulf %107, %111 : vector<1x32xf32>
    %113 = arith.index_cast %c4_i32 : i32 to index
    %c0_30 = arith.constant 0 : index
    %114 = vector.load %arg8[%113, %c0_30] : memref<8x32xf32, #tpu.memory_space<vmem>>, vector<1x32xf32>
    tpu.vector_store %arg8[%113, %c0_30], %112 {strides = array<i32>} : memref<8x32xf32, #tpu.memory_space<vmem>>, vector<1x32xf32>,
    %c5_i32 = arith.constant 5 : i32
    %115 = arith.index_cast %c5_i32 : i32 to index
    %c0_31 = arith.constant 0 : index
    %116 = vector.load %arg7[%115, %c0_31] : memref<8x128xf32, #tpu.memory_space<vmem>>, vector<1x128xf32>
    %cst_32 = arith.constant dense<0.000000e+00> : vector<1x128xf32>
    %117 = tpu.matmul %112, %7, %cst_32 {dimension_numbers = #tpu.dot_dimension_numbers<[1], [0], [0], [1], [0, 0, 1, 1], [], []>} : vector<1x32xf32>, vector<32x128xf32>, vector<1x128xf32> -> vector<1x128xf32>
    %118 = arith.addf %116, %117 : vector<1x128xf32>
    %119 = arith.negf %118 : vector<1x128xf32>
    %120 = math.exp %119 : vector<1x128xf32>
    %cst_33 = arith.constant 1.000000e+00 : f32
    %121 = vector.broadcast %cst_33 : f32 to vector<1x128xf32>
    %122 = arith.addf %121, %120 : vector<1x128xf32>
    %123 = arith.divf %121, %122 : vector<1x128xf32>
    %124 = math.tanh %118 : vector<1x128xf32>
    %125 = vector.extract_strided_slice %123 {offsets = [0, 0], sizes = [1, 32], strides = [1, 1]} : vector<1x128xf32> to vector<1x32xf32>
    %126 = vector.extract_strided_slice %123 {offsets = [0, 32], sizes = [1, 32], strides = [1, 1]} : vector<1x128xf32> to vector<1x32xf32>
    %127 = vector.extract_strided_slice %124 {offsets = [0, 64], sizes = [1, 32], strides = [1, 1]} : vector<1x128xf32> to vector<1x32xf32>
    %128 = vector.extract_strided_slice %123 {offsets = [0, 96], sizes = [1, 32], strides = [1, 1]} : vector<1x128xf32> to vector<1x32xf32>
    %129 = arith.mulf %126, %110 : vector<1x32xf32>
    %130 = arith.mulf %125, %127 : vector<1x32xf32>
    %131 = arith.addf %129, %130 : vector<1x32xf32>
    %132 = math.tanh %131 : vector<1x32xf32>
    %133 = arith.mulf %128, %132 : vector<1x32xf32>
    %134 = arith.index_cast %c5_i32 : i32 to index
    %c0_34 = arith.constant 0 : index
    %135 = vector.load %arg8[%134, %c0_34] : memref<8x32xf32, #tpu.memory_space<vmem>>, vector<1x32xf32>
    tpu.vector_store %arg8[%134, %c0_34], %133 {strides = array<i32>} : memref<8x32xf32, #tpu.memory_space<vmem>>, vector<1x32xf32>,
    %c6_i32 = arith.constant 6 : i32
    %136 = arith.index_cast %c6_i32 : i32 to index
    %c0_35 = arith.constant 0 : index
    %137 = vector.load %arg7[%136, %c0_35] : memref<8x128xf32, #tpu.memory_space<vmem>>, vector<1x128xf32>
    %cst_36 = arith.constant dense<0.000000e+00> : vector<1x128xf32>
    %138 = tpu.matmul %133, %7, %cst_36 {dimension_numbers = #tpu.dot_dimension_numbers<[1], [0], [0], [1], [0, 0, 1, 1], [], []>} : vector<1x32xf32>, vector<32x128xf32>, vector<1x128xf32> -> vector<1x128xf32>
    %139 = arith.addf %137, %138 : vector<1x128xf32>
    %140 = arith.negf %139 : vector<1x128xf32>
    %141 = math.exp %140 : vector<1x128xf32>
    %cst_37 = arith.constant 1.000000e+00 : f32
    %142 = vector.broadcast %cst_37 : f32 to vector<1x128xf32>
    %143 = arith.addf %142, %141 : vector<1x128xf32>
    %144 = arith.divf %142, %143 : vector<1x128xf32>
    %145 = math.tanh %139 : vector<1x128xf32>
    %146 = vector.extract_strided_slice %144 {offsets = [0, 0], sizes = [1, 32], strides = [1, 1]} : vector<1x128xf32> to vector<1x32xf32>
    %147 = vector.extract_strided_slice %144 {offsets = [0, 32], sizes = [1, 32], strides = [1, 1]} : vector<1x128xf32> to vector<1x32xf32>
    %148 = vector.extract_strided_slice %145 {offsets = [0, 64], sizes = [1, 32], strides = [1, 1]} : vector<1x128xf32> to vector<1x32xf32>
    %149 = vector.extract_strided_slice %144 {offsets = [0, 96], sizes = [1, 32], strides = [1, 1]} : vector<1x128xf32> to vector<1x32xf32>
    %150 = arith.mulf %147, %131 : vector<1x32xf32>
    %151 = arith.mulf %146, %148 : vector<1x32xf32>
    %152 = arith.addf %150, %151 : vector<1x32xf32>
    %153 = math.tanh %152 : vector<1x32xf32>
    %154 = arith.mulf %149, %153 : vector<1x32xf32>
    %155 = arith.index_cast %c6_i32 : i32 to index
    %c0_38 = arith.constant 0 : index
    %156 = vector.load %arg8[%155, %c0_38] : memref<8x32xf32, #tpu.memory_space<vmem>>, vector<1x32xf32>
    tpu.vector_store %arg8[%155, %c0_38], %154 {strides = array<i32>} : memref<8x32xf32, #tpu.memory_space<vmem>>, vector<1x32xf32>,
    %c7_i32 = arith.constant 7 : i32
    %157 = arith.index_cast %c7_i32 : i32 to index
    %c0_39 = arith.constant 0 : index
    %158 = vector.load %arg7[%157, %c0_39] : memref<8x128xf32, #tpu.memory_space<vmem>>, vector<1x128xf32>
    %cst_40 = arith.constant dense<0.000000e+00> : vector<1x128xf32>
    %159 = tpu.matmul %154, %7, %cst_40 {dimension_numbers = #tpu.dot_dimension_numbers<[1], [0], [0], [1], [0, 0, 1, 1], [], []>} : vector<1x32xf32>, vector<32x128xf32>, vector<1x128xf32> -> vector<1x128xf32>
    %160 = arith.addf %158, %159 : vector<1x128xf32>
    %161 = arith.negf %160 : vector<1x128xf32>
    %162 = math.exp %161 : vector<1x128xf32>
    %cst_41 = arith.constant 1.000000e+00 : f32
    %163 = vector.broadcast %cst_41 : f32 to vector<1x128xf32>
    %164 = arith.addf %163, %162 : vector<1x128xf32>
    %165 = arith.divf %163, %164 : vector<1x128xf32>
    %166 = math.tanh %160 : vector<1x128xf32>
    %167 = vector.extract_strided_slice %165 {offsets = [0, 0], sizes = [1, 32], strides = [1, 1]} : vector<1x128xf32> to vector<1x32xf32>
    %168 = vector.extract_strided_slice %165 {offsets = [0, 32], sizes = [1, 32], strides = [1, 1]} : vector<1x128xf32> to vector<1x32xf32>
    %169 = vector.extract_strided_slice %166 {offsets = [0, 64], sizes = [1, 32], strides = [1, 1]} : vector<1x128xf32> to vector<1x32xf32>
    %170 = vector.extract_strided_slice %165 {offsets = [0, 96], sizes = [1, 32], strides = [1, 1]} : vector<1x128xf32> to vector<1x32xf32>
    %171 = arith.mulf %168, %152 : vector<1x32xf32>
    %172 = arith.mulf %167, %169 : vector<1x32xf32>
    %173 = arith.addf %171, %172 : vector<1x32xf32>
    %174 = math.tanh %173 : vector<1x32xf32>
    %175 = arith.mulf %170, %174 : vector<1x32xf32>
    %176 = arith.index_cast %c7_i32 : i32 to index
    %c0_42 = arith.constant 0 : index
    %177 = vector.load %arg8[%176, %c0_42] : memref<8x32xf32, #tpu.memory_space<vmem>>, vector<1x32xf32>
    tpu.vector_store %arg8[%176, %c0_42], %175 {strides = array<i32>} : memref<8x32xf32, #tpu.memory_space<vmem>>, vector<1x32xf32>,
    %c8_i32 = arith.constant 8 : i32
    %c0_43 = arith.constant 0 : index
    %c0_44 = arith.constant 0 : index
    %178 = vector.load %arg8[%c0_43, %c0_44] : memref<8x32xf32, #tpu.memory_space<vmem>>, vector<8x32xf32>
    %c0_45 = arith.constant 0 : index
    %c0_46 = arith.constant 0 : index
    %179 = vector.load %arg4[%c0_45, %c0_46] : memref<32x128xf32, #tpu.memory_space<vmem>>, vector<32x128xf32>
    %cst_47 = arith.constant dense<0.000000e+00> : vector<8x128xf32>
    %180 = tpu.matmul %178, %179, %cst_47 {dimension_numbers = #tpu.dot_dimension_numbers<[1], [0], [0], [1], [0, 0, 1, 1], [], []>} : vector<8x32xf32>, vector<32x128xf32>, vector<8x128xf32> -> vector<8x128xf32>
    %c0_48 = arith.constant 0 : index
    %c0_49 = arith.constant 0 : index
    %181 = vector.load %arg5[%c0_48, %c0_49] : memref<1x128xf32, #tpu.memory_space<vmem>>, vector<1x128xf32>
    %182 = vector.broadcast %181 : vector<1x128xf32> to vector<8x128xf32>
    %183 = arith.addf %180, %182 : vector<8x128xf32>
    %c0_50 = arith.constant 0 : index
    %c0_51 = arith.constant 0 : index
    %184 = vector.load %arg6[%c0_50, %c0_51] : memref<8x128xf32, #tpu.memory_space<vmem>>, vector<8x128xf32>
    tpu.vector_store %arg6[%c0_50, %c0_51], %183 {strides = array<i32>} : memref<8x128xf32, #tpu.memory_space<vmem>>, vector<8x128xf32>,
    return
  }
}

</mosaic_0001>

<bundles_post_ra>
// kernel: tpu_custom_call.1
= control target key start
LH: loop header
LB: loop body
LE: loop exit
PB: predicated region body
PF: predicated region fallthrough
CT: control target
= control target key end

     0   :  { %11 = vsyncpa [#allocation5], 0  ;;  %s1039_s0 = inlined_call_operand.hbm [shape: f32[8,16], index: 0, kind: input, shape index: {}]   ;;  %s1040_s1 = inlined_call_operand.hbm [shape: f32[16,128], index: 1, kind: input, shape index: {}]   ;;  %s1041_s2 = inlined_call_operand.hbm [shape: f32[32,128], index: 2, kind: input, shape index: {}]   ;;  %s1042_s3 = inlined_call_operand.vmem [shape: f32[1,128], index: 3, kind: input, shape index: {}]   ;;  %s1043_s4 = inlined_call_operand.hbm [shape: f32[32,128], index: 4, kind: input, shape index: {}]   ;;  %s1044_s5 = inlined_call_operand.vmem [shape: f32[1,128], index: 5, kind: input, shape index: {}]   ;;  %s1045_s6 = inlined_call_operand.hbm [shape: f32[8,128], index: 6, kind: output, shape index: {}]  }
   0x1   :  { %12 = vsyncpa [#allocation8], 0 }
   0x2   :  { %13 = vsyncpa [#allocation11], 0  ;;  %s30_s23 = sshll.u32 %s1040_s1, 4  ;;  %s31_s23 = int_to_ptr.hbm [resolvable:$true] %s30_s23 }
   0x3   :  { %14 = vsyncpa [#allocation6], 0  ;;  %s925_s24 = smov [#allocation7]   ;;  %s20_s28 = sshll.u32 %s1039_s0, 4  ;;  %s21_s28 = int_to_ptr.hbm [resolvable:$true] %s20_s28 }
   0x4   :  { %s32_s25 = sshll.u32 %s925_s24, 4  ;;  %s926_s29 = smov 128   ;;  %s33_s25 = int_to_ptr.vmem [resolvable:$true] %s32_s25 }
   0x5   :  { %s927_s30 = smov 8   ;;  %s928_s7 = smov [#allocation4]  }
   0x6   :  { %38 = dma.hbm_to_vmem [thread:$0]  %s31_s23, 256, %s33_s25, [#allocation8], %s926_s29, %s926_s29, %s927_s30  }
   0x7   :  { %s22_s8 = sshll.u32 %s928_s7, 4  ;;  %s43_s11 = sshll.u32 %s1041_s2, 4  ;;  %s23_s8 = int_to_ptr.vmem [resolvable:$true] %s22_s8  ;;  %s44_s11 = int_to_ptr.hbm [resolvable:$true] %s43_s11 }
   0x8   :  { %25 = dma.hbm_to_vmem [thread:$0]  %s21_s28, 128, %s23_s8, [#allocation5]  }
   0x9   :  { %s58_s13 = sshll.u32 %s1043_s4, 4  ;;  %s929_s14 = smov [#allocation9]   ;;  %s59_s13 = int_to_ptr.hbm [resolvable:$true] %s58_s13 }
   0xa   :  { %s45_s15 = sshll.u32 %s929_s14, 4  ;;  %s930_s0 = smov [#allocation10]   ;;  %s46_s15 = int_to_ptr.vmem [resolvable:$true] %s45_s15 }
   0xb   :  { %51 = dma.hbm_to_vmem [thread:$0]  %s44_s11, 512, %s46_s15, [#allocation8], %s926_s29, %s926_s29, %s927_s30  }
   0xc   :  { %s60_s16 = sshll.u32 %s930_s0, 4  ;;  %s61_s16 = int_to_ptr.vmem [resolvable:$true] %s60_s16 }
   0xd   :  { %66 = dma.hbm_to_vmem [thread:$0]  %s59_s13, 512, %s61_s16, [#allocation11], %s926_s29, %s926_s29, %s927_s30  }
   0xe   :  { %917 = dma.done.wait [#allocation5], 128  }
   0xf   :  { %918 = vsyncadd [#allocation5], 4294967168 }
  0x10   :  { %919 = dma.done.wait [#allocation8], 768  }
  0x11   :  { %920 = vsyncadd [#allocation8], 4294966528 }
  0x12   :  { %921 = dma.done.wait [#allocation11], 512  }
  0x13   :  { %922 = vsyncadd [#allocation11], 4294966784  ;;  %v87_v0 = vld [vmem:[#allocation7 + $0x8] sm:$0xff]  ;;  %v86_v1 = vld [vmem:[#allocation7] sm:$0xff]  ;;  %vm92_vm0 = vcmask 130048   ;;  %v931_v7 = vmov 0.0  }
  0x14   :  { %110 = vmatpush.msra.mxu0 %v87_v0  ;;  %v85_v2 = vld [vmem:[#allocation4] sm:$0xff]  ;;  %v120_v3 = vld [vmem:[#allocation9 + $0x18] sm:$0xff]  ;;  %v119_v4 = vld [vmem:[#allocation9 + $0x10] sm:$0xff]  ;;  %s932_s17 = smov 64   ;;  %vm188_vm5 = vcmask 253952   ;;  %vm122_vm6 = vcmask 261120  }
  0x15   :  { %138 = vmatpush.msra.mxu1 %v120_v3  ;;  %205 = vmatpush.msra.mxu2 %v120_v3  ;;  %v118_v5 = vld [vmem:[#allocation9 + $0x8] sm:$0xff]  ;;  %v117_v6 = vld [vmem:[#allocation9] sm:$0xff]  ;;  %v731_v8 = vld [vmem:[%s1042_s3] ss:$0 sm:$0xff]  ;;  %s933_s3 = smov 32   ;;  %s934_s20 = smov [#allocation12]  }
  0x16   :  { %111 = vmatpush.msra.mxu0 %v86_v1  ;;  %271 = vmatpush.msra.mxu3 %v120_v3  ;;  %s690_s21 = sshll.u32 %s934_s20, 4  ;;  %s692_s24 = sshll.u32 %s1045_s6, 4  ;;  %s691_s21 = int_to_ptr.vmem [resolvable:$true] %s690_s21  ;;  %s693_s24 = int_to_ptr.hbm [resolvable:$true] %s692_s24 }
  0x17   :  { %704 = vmatmul.msk.f32.vlgmr.msra.gmra.mxu0 %vm92_vm0, %v85_v2  ;;  %139 = vmatpush.msra.mxu1 %v119_v4 }
  0x18   :  { %206 = vmatpush.msra.mxu2 %v119_v4  ;;  %272 = vmatpush.msra.mxu3 %v119_v4 }
  0x19   :  { %140 = vmatpush.msra.mxu1 %v118_v5  ;;  %337 = vmatpush.msrb.mxu0 %v120_v3 }
  0x1a   :  { %207 = vmatpush.msra.mxu2 %v118_v5  ;;  %273 = vmatpush.msra.mxu3 %v118_v5 }
  0x1b   :  { %141 = vmatpush.msra.mxu1 %v117_v6  ;;  %338 = vmatpush.msrb.mxu0 %v119_v4 }
  0x1c   :  { %142 = vmatmul.f32.vlgmr.msra.gmra.mxu1 %v931_v7  ;;  %208 = vmatpush.msra.mxu2 %v117_v6 }
  0x1d   :  { %274 = vmatpush.msra.mxu3 %v117_v6  ;;  %339 = vmatpush.msrb.mxu0 %v118_v5 }
  0x1e   :  { %403 = vmatpush.msrb.mxu1 %v120_v3  ;;  %469 = vmatpush.msrb.mxu2 %v120_v3 }
  0x1f   :  { %340 = vmatpush.msrb.mxu0 %v117_v6  ;;  %535 = vmatpush.msrb.mxu3 %v120_v3 }
  0x20   :  { %404 = vmatpush.msrb.mxu1 %v119_v4  ;;  %470 = vmatpush.msrb.mxu2 %v119_v4 }
  0x21   :  { %536 = vmatpush.msrb.mxu3 %v119_v4  ;;  %601 = vmatpush.msra.mxu0 %v120_v3 }
  0x22   :  { %405 = vmatpush.msrb.mxu1 %v118_v5  ;;  %471 = vmatpush.msrb.mxu2 %v118_v5 }
  0x23   :  { %537 = vmatpush.msrb.mxu3 %v118_v5  ;;  %602 = vmatpush.msra.mxu0 %v119_v4 }
  0x24   :  { %406 = vmatpush.msrb.mxu1 %v117_v6  ;;  %472 = vmatpush.msrb.mxu2 %v117_v6 }
  0x25   :  { %538 = vmatpush.msrb.mxu3 %v117_v6  ;;  %603 = vmatpush.msra.mxu0 %v118_v5 }
  0x27   :  { %604 = vmatpush.msra.mxu0 %v117_v6 }
  0x94   :  { %v113_v9 = vpop.f32.mrf.mxu0 }
  0x95   :  { %v114_v10 = vadd.f32 %v731_v8, %v113_v9 }
  0x97   :  { %116 = vst [vmem:[#allocation2] sm:$0xff] %v114_v10 }
  0x99   :  { %v143_v11 = vpop.f32.mrf.mxu1 }
  0x9e   :  { %v121_v12 = vld [vmem:[#allocation2] sm:$0x1]  ;;  %v190_v37 = vld [vmem:[#allocation2 + $0x1] sm:$0x1]  ;;  %v256_v63 = vld [vmem:[#allocation2 + $0x2] sm:$0x1] }
  0x9f   :  { %v146_v13 = vadd.f32 %v143_v11, %v121_v12 }
  0xa1   :  { %733 = vtanh.f32 %v146_v13  ;;  %v705_v15 = vmul.f32 -1.442695, %v146_v13 }
  0xa3   :  { %735 = vpow2.f32 %v705_v15 }
  0xa7   :  { %v734_v14 = vpop.eup %733 }
  0xa8   :  { %169 = vrot.lane.b32.xlu0 %v734_v14, %s932_s17 }
  0xa9   :  { %v736_v16 = vpop.eup %735 }
  0xaa   :  { %v150_v17 = vadd.f32 1.0, %v736_v16 }
  0xac   :  { %737 = vrcp.f32 %v150_v17  ;;  %v162_v23 = vand.u32 2147483648, %v150_v17  ;;  %vm156_vm2 = vweird.f32 %v150_v17  ;;  %v160_v24 = vand.u32 2147483647, %v150_v17 }
  0xae   :  { %v163_v26 = vor.u32 1.1754944e-38, %v162_v23  ;;  %vm161_vm4 = vcmp.eq.f32.partialorder %v160_v24, 8.507059e+37 }
  0xb2   :  { %v738_v18 = vpop.eup %737 }
  0xb3   :  { %v152_v19 = vmul.f32 %v738_v18, %v150_v17  ;;  %vm157_vm1 = vweird.f32 %v738_v18 }
  0xb4   :  { %vm158_vm3 = vmor %vm156_vm2, %vm157_vm1 }
  0xb5   :  { %v153_v20 = vsub.f32 1.0, %v152_v19 }
  0xb7   :  { %v154_v21 = vmul.f32 %v738_v18, %v153_v20 }
  0xb9   :  { %v155_v22 = vadd.f32 %v738_v18, %v154_v21 }
  0xbb   :  { %v159_v25 = vsel %vm158_vm3, %v738_v18, %v155_v22 }
  0xbc   :  { %v164_v28 = vsel %vm161_vm4, %v163_v26, %v159_v25  ;;  %v322_v25 = vld [vmem:[#allocation2 + $0x3] sm:$0x1] }
  0xbd   :  { %v167_v30 = vmul.f32 0.0, %v164_v28 }
 0x11a   :  { %v170_v27 = vpop.permute.xlu0 %169 }
 0x11b   :  { %v172_v29 = vmul.f32 %v170_v27, %v164_v28 }
 0x11d   :  { %174 = vrot.lane.b32.xlu0 %v172_v29, %s933_s3 }
 0x18f   :  { %v175_v31 = vpop.permute.xlu0 %174 }
 0x190   :  { %v177_v32 = vadd.f32 %v175_v31, %v167_v30 }
 0x192   :  { %739 = vtanh.f32 %v177_v32 }
 0x198   :  { %v740_v33 = vpop.eup %739 }
 0x199   :  { %180 = vrot.lane.b32.xlu1 %v740_v33, %s932_s17 }
 0x20b   :  { %v181_v34 = vpop.permute.xlu1 %180 }
 0x20c   :  { %v183_v35 = vmul.f32 %v181_v34, %v164_v28 }
 0x20e   :  { %185 = vrot.lane.b32.xlu1 %v183_v35, %s933_s3 }
 0x280   :  { %v186_v36 = vpop.permute.xlu1 %185 }
 0x281   :  { %189 = vst.msk [vmem:[#allocation3] sm:$0x1] %vm188_vm5, %v186_v36  ;;  %706 = vmatmul.msk.f32.vlgmr.msra.gmra.mxu2 %vm122_vm6, %v186_v36 }
 0x304   :  { %v210_v38 = vpop.f32.mrf.mxu2 }
 0x305   :  { %v213_v39 = vadd.f32 %v210_v38, %v190_v37 }
 0x307   :  { %741 = vtanh.f32 %v213_v39  ;;  %v707_v41 = vmul.f32 -1.442695, %v213_v39 }
 0x309   :  { %743 = vpow2.f32 %v707_v41 }
 0x30d   :  { %v742_v40 = vpop.eup %741 }
 0x30e   :  { %236 = vrot.lane.b32.xlu2 %v742_v40, %s932_s17 }
 0x30f   :  { %v744_v42 = vpop.eup %743 }
 0x310   :  { %v217_v43 = vadd.f32 1.0, %v744_v42 }
 0x312   :  { %745 = vrcp.f32 %v217_v43  ;;  %v229_v49 = vand.u32 2147483648, %v217_v43  ;;  %vm223_vm8 = vweird.f32 %v217_v43  ;;  %v227_v50 = vand.u32 2147483647, %v217_v43 }
 0x314   :  { %v230_v52 = vor.u32 1.1754944e-38, %v229_v49  ;;  %vm228_vm10 = vcmp.eq.f32.partialorder %v227_v50, 8.507059e+37 }
 0x318   :  { %v746_v44 = vpop.eup %745 }
 0x319   :  { %v219_v45 = vmul.f32 %v746_v44, %v217_v43  ;;  %vm224_vm7 = vweird.f32 %v746_v44 }
 0x31a   :  { %vm225_vm9 = vmor %vm223_vm8, %vm224_vm7 }
 0x31b   :  { %v220_v46 = vsub.f32 1.0, %v219_v45 }
 0x31d   :  { %v221_v47 = vmul.f32 %v746_v44, %v220_v46 }
 0x31f   :  { %v222_v48 = vadd.f32 %v746_v44, %v221_v47 }
 0x321   :  { %v226_v51 = vsel %vm225_vm9, %v746_v44, %v222_v48 }
 0x322   :  { %v231_v54 = vsel %vm228_vm10, %v230_v52, %v226_v51  ;;  %v388_v51 = vld [vmem:[#allocation2 + $0x4] sm:$0x1] }
 0x323   :  { %v234_v56 = vmul.f32 %v231_v54, %v177_v32 }
 0x368   :  { %v237_v53 = vpop.permute.xlu2 %236 }
 0x369   :  { %v239_v55 = vmul.f32 %v237_v53, %v231_v54 }
 0x36b   :  { %241 = vrot.lane.b32.xlu2 %v239_v55, %s933_s3 }
 0x3c5   :  { %v242_v57 = vpop.permute.xlu2 %241 }
 0x3c6   :  { %v244_v58 = vadd.f32 %v242_v57, %v234_v56 }
 0x3c8   :  { %747 = vtanh.f32 %v244_v58 }
 0x3ce   :  { %v748_v59 = vpop.eup %747 }
 0x3cf   :  { %247 = vrot.lane.b32.xlu0 %v748_v59, %s932_s17 }
 0x441   :  { %v248_v60 = vpop.permute.xlu0 %247 }
 0x442   :  { %v250_v61 = vmul.f32 %v248_v60, %v231_v54 }
 0x444   :  { %252 = vrot.lane.b32.xlu1 %v250_v61, %s933_s3 }
 0x4b6   :  { %v253_v62 = vpop.permute.xlu1 %252 }
 0x4b7   :  { %255 = vst.msk [vmem:[#allocation3 + $0x1] sm:$0x1] %vm188_vm5, %v253_v62  ;;  %708 = vmatmul.msk.f32.vlgmr.msra.gmra.mxu3 %vm122_vm6, %v253_v62 }
 0x53a   :  { %v276_v0 = vpop.f32.mrf.mxu3 }
 0x53b   :  { %v279_v1 = vadd.f32 %v276_v0, %v256_v63 }
 0x53d   :  { %749 = vtanh.f32 %v279_v1  ;;  %v709_v3 = vmul.f32 -1.442695, %v279_v1 }
 0x53f   :  { %751 = vpow2.f32 %v709_v3 }
 0x543   :  { %v750_v2 = vpop.eup %749 }
 0x544   :  { %302 = vrot.lane.b32.xlu2 %v750_v2, %s932_s17 }
 0x545   :  { %v752_v4 = vpop.eup %751 }
 0x546   :  { %v283_v5 = vadd.f32 1.0, %v752_v4 }
 0x548   :  { %753 = vrcp.f32 %v283_v5  ;;  %v295_v11 = vand.u32 2147483648, %v283_v5  ;;  %vm289_vm12 = vweird.f32 %v283_v5  ;;  %v293_v12 = vand.u32 2147483647, %v283_v5 }
 0x54a   :  { %v296_v14 = vor.u32 1.1754944e-38, %v295_v11  ;;  %vm294_vm14 = vcmp.eq.f32.partialorder %v293_v12, 8.507059e+37 }
 0x54e   :  { %v754_v6 = vpop.eup %753 }
 0x54f   :  { %v285_v7 = vmul.f32 %v754_v6, %v283_v5  ;;  %vm290_vm11 = vweird.f32 %v754_v6 }
 0x550   :  { %vm291_vm13 = vmor %vm289_vm12, %vm290_vm11 }
 0x551   :  { %v286_v8 = vsub.f32 1.0, %v285_v7 }
 0x553   :  { %v287_v9 = vmul.f32 %v754_v6, %v286_v8 }
 0x555   :  { %v288_v10 = vadd.f32 %v754_v6, %v287_v9 }
 0x557   :  { %v292_v13 = vsel %vm291_vm13, %v754_v6, %v288_v10 }
 0x558   :  { %v297_v16 = vsel %vm294_vm14, %v296_v14, %v292_v13  ;;  %v454_v13 = vld [vmem:[#allocation2 + $0x5] sm:$0x1] }
 0x559   :  { %v300_v18 = vmul.f32 %v297_v16, %v244_v58 }
 0x59e   :  { %v303_v15 = vpop.permute.xlu2 %302 }
 0x59f   :  { %v305_v17 = vmul.f32 %v303_v15, %v297_v16 }
 0x5a1   :  { %307 = vrot.lane.b32.xlu0 %v305_v17, %s933_s3 }
 0x613   :  { %v308_v19 = vpop.permute.xlu0 %307 }
 0x614   :  { %v310_v20 = vadd.f32 %v308_v19, %v300_v18 }
 0x616   :  { %755 = vtanh.f32 %v310_v20 }
 0x61c   :  { %v756_v21 = vpop.eup %755 }
 0x61d   :  { %313 = vrot.lane.b32.xlu1 %v756_v21, %s932_s17 }
 0x68f   :  { %v314_v22 = vpop.permute.xlu1 %313 }
 0x690   :  { %v316_v23 = vmul.f32 %v314_v22, %v297_v16 }
 0x692   :  { %318 = vrot.lane.b32.xlu2 %v316_v23, %s933_s3 }
 0x6ec   :  { %v319_v24 = vpop.permute.xlu2 %318 }
 0x6ed   :  { %321 = vst.msk [vmem:[#allocation3 + $0x2] sm:$0x1] %vm188_vm5, %v319_v24  ;;  %710 = vmatmul.msk.f32.vlgmr.msrb.gmra.mxu0 %vm122_vm6, %v319_v24 }
 0x76a   :  { %v342_v26 = vpop.f32.mrf.mxu0 }
 0x76b   :  { %v345_v27 = vadd.f32 %v342_v26, %v322_v25 }
 0x76d   :  { %757 = vtanh.f32 %v345_v27  ;;  %v711_v29 = vmul.f32 -1.442695, %v345_v27 }
 0x76f   :  { %759 = vpow2.f32 %v711_v29 }
 0x773   :  { %v758_v28 = vpop.eup %757 }
 0x774   :  { %368 = vrot.lane.b32.xlu0 %v758_v28, %s932_s17 }
 0x775   :  { %v760_v30 = vpop.eup %759 }
 0x776   :  { %v349_v31 = vadd.f32 1.0, %v760_v30 }
 0x778   :  { %761 = vrcp.f32 %v349_v31  ;;  %v361_v37 = vand.u32 2147483648, %v349_v31  ;;  %vm355_vm0 = vweird.f32 %v349_v31  ;;  %v359_v38 = vand.u32 2147483647, %v349_v31 }
 0x77a   :  { %v362_v40 = vor.u32 1.1754944e-38, %v361_v37  ;;  %vm360_vm2 = vcmp.eq.f32.partialorder %v359_v38, 8.507059e+37 }
 0x77e   :  { %v762_v32 = vpop.eup %761 }
 0x77f   :  { %v351_v33 = vmul.f32 %v762_v32, %v349_v31  ;;  %vm356_vm15 = vweird.f32 %v762_v32 }
 0x780   :  { %vm357_vm1 = vmor %vm355_vm0, %vm356_vm15 }
 0x781   :  { %v352_v34 = vsub.f32 1.0, %v351_v33 }
 0x783   :  { %v353_v35 = vmul.f32 %v762_v32, %v352_v34 }
 0x785   :  { %v354_v36 = vadd.f32 %v762_v32, %v353_v35 }
 0x787   :  { %v358_v39 = vsel %vm357_vm1, %v762_v32, %v354_v36 }
 0x788   :  { %v363_v42 = vsel %vm360_vm2, %v362_v40, %v358_v39  ;;  %v520_v39 = vld [vmem:[#allocation2 + $0x6] sm:$0x1] }
 0x789   :  { %v366_v44 = vmul.f32 %v363_v42, %v310_v20 }
 0x7e6   :  { %v369_v41 = vpop.permute.xlu0 %368 }
 0x7e7   :  { %v371_v43 = vmul.f32 %v369_v41, %v363_v42 }
 0x7e9   :  { %373 = vrot.lane.b32.xlu1 %v371_v43, %s933_s3 }
 0x85b   :  { %v374_v45 = vpop.permute.xlu1 %373 }
 0x85c   :  { %v376_v46 = vadd.f32 %v374_v45, %v366_v44 }
 0x85e   :  { %763 = vtanh.f32 %v376_v46 }
 0x864   :  { %v764_v47 = vpop.eup %763 }
 0x865   :  { %379 = vrot.lane.b32.xlu2 %v764_v47, %s932_s17 }
 0x8bf   :  { %v380_v48 = vpop.permute.xlu2 %379 }
 0x8c0   :  { %v382_v49 = vmul.f32 %v380_v48, %v363_v42 }
 0x8c2   :  { %384 = vrot.lane.b32.xlu0 %v382_v49, %s933_s3 }
 0x934   :  { %v385_v50 = vpop.permute.xlu0 %384 }
 0x935   :  { %387 = vst.msk [vmem:[#allocation3 + $0x3] sm:$0x1] %vm188_vm5, %v385_v50  ;;  %712 = vmatmul.msk.f32.vlgmr.msrb.gmra.mxu1 %vm122_vm6, %v385_v50 }
 0x9b2   :  { %v408_v52 = vpop.f32.mrf.mxu1 }
 0x9b3   :  { %v411_v53 = vadd.f32 %v408_v52, %v388_v51 }
 0x9b5   :  { %765 = vtanh.f32 %v411_v53  ;;  %v713_v55 = vmul.f32 -1.442695, %v411_v53 }
 0x9b7   :  { %767 = vpow2.f32 %v713_v55 }
 0x9bb   :  { %v766_v54 = vpop.eup %765 }
 0x9bc   :  { %434 = vrot.lane.b32.xlu1 %v766_v54, %s932_s17 }
 0x9bd   :  { %v768_v56 = vpop.eup %767 }
 0x9be   :  { %v415_v57 = vadd.f32 1.0, %v768_v56 }
 0x9c0   :  { %769 = vrcp.f32 %v415_v57  ;;  %v427_v63 = vand.u32 2147483648, %v415_v57  ;;  %vm421_vm4 = vweird.f32 %v415_v57  ;;  %v425_v0 = vand.u32 2147483647, %v415_v57 }
 0x9c2   :  { %v428_v2 = vor.u32 1.1754944e-38, %v427_v63  ;;  %vm426_vm8 = vcmp.eq.f32.partialorder %v425_v0, 8.507059e+37 }
 0x9c6   :  { %v770_v58 = vpop.eup %769 }
 0x9c7   :  { %v417_v59 = vmul.f32 %v770_v58, %v415_v57  ;;  %vm422_vm3 = vweird.f32 %v770_v58 }
 0x9c8   :  { %vm423_vm7 = vmor %vm421_vm4, %vm422_vm3 }
 0x9c9   :  { %v418_v60 = vsub.f32 1.0, %v417_v59 }
 0x9cb   :  { %v419_v61 = vmul.f32 %v770_v58, %v418_v60 }
 0x9cd   :  { %v420_v62 = vadd.f32 %v770_v58, %v419_v61 }
 0x9cf   :  { %v424_v1 = vsel %vm423_vm7, %v770_v58, %v420_v62 }
 0x9d0   :  { %v429_v4 = vsel %vm426_vm8, %v428_v2, %v424_v1  ;;  %v586_v1 = vld [vmem:[#allocation2 + $0x7] sm:$0x1] }
 0x9d1   :  { %v432_v6 = vmul.f32 %v429_v4, %v376_v46 }
 0xa2e   :  { %v435_v3 = vpop.permute.xlu1 %434 }
 0xa2f   :  { %v437_v5 = vmul.f32 %v435_v3, %v429_v4 }
 0xa31   :  { %439 = vrot.lane.b32.xlu2 %v437_v5, %s933_s3 }
 0xa8b   :  { %v440_v7 = vpop.permute.xlu2 %439 }
 0xa8c   :  { %v442_v8 = vadd.f32 %v440_v7, %v432_v6 }
 0xa8e   :  { %771 = vtanh.f32 %v442_v8 }
 0xa94   :  { %v772_v9 = vpop.eup %771 }
 0xa95   :  { %445 = vrot.lane.b32.xlu0 %v772_v9, %s932_s17 }
 0xb07   :  { %v446_v10 = vpop.permute.xlu0 %445 }
 0xb08   :  { %v448_v11 = vmul.f32 %v446_v10, %v429_v4 }
 0xb0a   :  { %450 = vrot.lane.b32.xlu1 %v448_v11, %s933_s3 }
 0xb7c   :  { %v451_v12 = vpop.permute.xlu1 %450 }
 0xb7d   :  { %453 = vst.msk [vmem:[#allocation3 + $0x4] sm:$0x1] %vm188_vm5, %v451_v12  ;;  %714 = vmatmul.msk.f32.vlgmr.msrb.gmra.mxu2 %vm122_vm6, %v451_v12 }
 0xc00   :  { %v474_v14 = vpop.f32.mrf.mxu2 }
 0xc01   :  { %v477_v15 = vadd.f32 %v474_v14, %v454_v13 }
 0xc03   :  { %773 = vtanh.f32 %v477_v15  ;;  %v715_v17 = vmul.f32 -1.442695, %v477_v15 }
 0xc05   :  { %775 = vpow2.f32 %v715_v17 }
 0xc09   :  { %v774_v16 = vpop.eup %773 }
 0xc0a   :  { %500 = vrot.lane.b32.xlu2 %v774_v16, %s932_s17 }
 0xc0b   :  { %v776_v18 = vpop.eup %775 }
 0xc0c   :  { %v481_v19 = vadd.f32 1.0, %v776_v18 }
 0xc0e   :  { %777 = vrcp.f32 %v481_v19  ;;  %v493_v25 = vand.u32 2147483648, %v481_v19  ;;  %vm487_vm10 = vweird.f32 %v481_v19  ;;  %v491_v26 = vand.u32 2147483647, %v481_v19 }
 0xc10   :  { %v494_v28 = vor.u32 1.1754944e-38, %v493_v25  ;;  %vm492_vm12 = vcmp.eq.f32.partialorder %v491_v26, 8.507059e+37  ;;  %v656_v26 = vld [vmem:[#allocation10 + $0x18] sm:$0xff] }
 0xc11   :  { %676 = vmatpush.msra.mxu1 %v656_v26 }
 0xc14   :  { %v778_v20 = vpop.eup %777 }
 0xc15   :  { %v483_v21 = vmul.f32 %v778_v20, %v481_v19  ;;  %vm488_vm9 = vweird.f32 %v778_v20 }
 0xc16   :  { %vm489_vm11 = vmor %vm487_vm10, %vm488_vm9 }
 0xc17   :  { %v484_v22 = vsub.f32 1.0, %v483_v21 }
 0xc19   :  { %v485_v23 = vmul.f32 %v778_v20, %v484_v22 }
 0xc1b   :  { %v486_v24 = vadd.f32 %v778_v20, %v485_v23 }
 0xc1d   :  { %v490_v27 = vsel %vm489_vm11, %v778_v20, %v486_v24 }
 0xc1e   :  { %v495_v30 = vsel %vm492_vm12, %v494_v28, %v490_v27  ;;  %v655_v27 = vld [vmem:[#allocation10 + $0x10] sm:$0xff]  ;;  %v654_v28 = vld [vmem:[#allocation10 + $0x8] sm:$0xff] }
 0xc1f   :  { %v498_v32 = vmul.f32 %v495_v30, %v442_v8  ;;  %677 = vmatpush.msra.mxu1 %v655_v27 }
 0xc21   :  { %678 = vmatpush.msra.mxu1 %v654_v28 }
 0xc64   :  { %v501_v29 = vpop.permute.xlu2 %500 }
 0xc65   :  { %v503_v31 = vmul.f32 %v501_v29, %v495_v30  ;;  %v653_v29 = vld [vmem:[#allocation10] sm:$0xff] }
 0xc66   :  { %679 = vmatpush.msra.mxu1 %v653_v29 }
 0xc67   :  { %505 = vrot.lane.b32.xlu0 %v503_v31, %s933_s3 }
 0xcd9   :  { %v506_v33 = vpop.permute.xlu0 %505 }
 0xcda   :  { %v508_v34 = vadd.f32 %v506_v33, %v498_v32  ;;  %v732_v32 = vld [vmem:[%s1044_s5] ss:$0 sm:$0xff] }
 0xcdc   :  { %779 = vtanh.f32 %v508_v34 }
 0xce2   :  { %v780_v35 = vpop.eup %779 }
 0xce3   :  { %511 = vrot.lane.b32.xlu1 %v780_v35, %s932_s17 }
 0xd55   :  { %v512_v36 = vpop.permute.xlu1 %511 }
 0xd56   :  { %v514_v37 = vmul.f32 %v512_v36, %v495_v30 }
 0xd58   :  { %516 = vrot.lane.b32.xlu2 %v514_v37, %s933_s3 }
 0xdb2   :  { %v517_v38 = vpop.permute.xlu2 %516 }
 0xdb3   :  { %519 = vst.msk [vmem:[#allocation3 + $0x5] sm:$0x1] %vm188_vm5, %v517_v38  ;;  %716 = vmatmul.msk.f32.vlgmr.msrb.gmra.mxu3 %vm122_vm6, %v517_v38 }
 0xe36   :  { %v540_v40 = vpop.f32.mrf.mxu3 }
 0xe37   :  { %v543_v41 = vadd.f32 %v540_v40, %v520_v39 }
 0xe39   :  { %781 = vtanh.f32 %v543_v41  ;;  %v717_v43 = vmul.f32 -1.442695, %v543_v41 }
 0xe3b   :  { %783 = vpow2.f32 %v717_v43 }
 0xe3f   :  { %v782_v42 = vpop.eup %781 }
 0xe40   :  { %566 = vrot.lane.b32.xlu0 %v782_v42, %s932_s17 }
 0xe41   :  { %v784_v44 = vpop.eup %783 }
 0xe42   :  { %v547_v45 = vadd.f32 1.0, %v784_v44 }
 0xe44   :  { %785 = vrcp.f32 %v547_v45  ;;  %v559_v51 = vand.u32 2147483648, %v547_v45  ;;  %vm553_vm14 = vweird.f32 %v547_v45  ;;  %v557_v52 = vand.u32 2147483647, %v547_v45 }
 0xe46   :  { %v560_v54 = vor.u32 1.1754944e-38, %v559_v51  ;;  %vm558_vm0 = vcmp.eq.f32.partialorder %v557_v52, 8.507059e+37 }
 0xe4a   :  { %v786_v46 = vpop.eup %785 }
 0xe4b   :  { %v549_v47 = vmul.f32 %v786_v46, %v547_v45  ;;  %vm554_vm13 = vweird.f32 %v786_v46 }
 0xe4c   :  { %vm555_vm15 = vmor %vm553_vm14, %vm554_vm13 }
 0xe4d   :  { %v550_v48 = vsub.f32 1.0, %v549_v47 }
 0xe4f   :  { %v551_v49 = vmul.f32 %v786_v46, %v550_v48 }
 0xe51   :  { %v552_v50 = vadd.f32 %v786_v46, %v551_v49 }
 0xe53   :  { %v556_v53 = vsel %vm555_vm15, %v786_v46, %v552_v50 }
 0xe54   :  { %v561_v56 = vsel %vm558_vm0, %v560_v54, %v556_v53 }
 0xe55   :  { %v564_v58 = vmul.f32 %v561_v56, %v508_v34 }
 0xeb2   :  { %v567_v55 = vpop.permute.xlu0 %566 }
 0xeb3   :  { %v569_v57 = vmul.f32 %v567_v55, %v561_v56 }
 0xeb5   :  { %571 = vrot.lane.b32.xlu1 %v569_v57, %s933_s3 }
 0xf27   :  { %v572_v59 = vpop.permute.xlu1 %571 }
 0xf28   :  { %v574_v60 = vadd.f32 %v572_v59, %v564_v58 }
 0xf2a   :  { %787 = vtanh.f32 %v574_v60 }
 0xf30   :  { %v788_v61 = vpop.eup %787 }
 0xf31   :  { %577 = vrot.lane.b32.xlu2 %v788_v61, %s932_s17 }
 0xf8b   :  { %v578_v62 = vpop.permute.xlu2 %577 }
 0xf8c   :  { %v580_v63 = vmul.f32 %v578_v62, %v561_v56 }
 0xf8e   :  { %582 = vrot.lane.b32.xlu0 %v580_v63, %s933_s3 }
0x1000   :  { %v583_v0 = vpop.permute.xlu0 %582 }
0x1001   :  { %585 = vst.msk [vmem:[#allocation3 + $0x6] sm:$0x1] %vm188_vm5, %v583_v0  ;;  %718 = vmatmul.msk.f32.vlgmr.msra.gmra.mxu0 %vm122_vm6, %v583_v0 }
0x107e   :  { %v606_v2 = vpop.f32.mrf.mxu0 }
0x107f   :  { %v609_v3 = vadd.f32 %v606_v2, %v586_v1 }
0x1081   :  { %789 = vtanh.f32 %v609_v3  ;;  %v719_v5 = vmul.f32 -1.442695, %v609_v3 }
0x1083   :  { %791 = vpow2.f32 %v719_v5 }
0x1087   :  { %v790_v4 = vpop.eup %789 }
0x1088   :  { %632 = vrot.lane.b32.xlu1 %v790_v4, %s932_s17 }
0x1089   :  { %v792_v6 = vpop.eup %791 }
0x108a   :  { %v613_v7 = vadd.f32 1.0, %v792_v6 }
0x108c   :  { %793 = vrcp.f32 %v613_v7  ;;  %v625_v13 = vand.u32 2147483648, %v613_v7  ;;  %vm619_vm2 = vweird.f32 %v613_v7  ;;  %v623_v14 = vand.u32 2147483647, %v613_v7 }
0x108e   :  { %v626_v16 = vor.u32 1.1754944e-38, %v625_v13  ;;  %vm624_vm4 = vcmp.eq.f32.partialorder %v623_v14, 8.507059e+37 }
0x1092   :  { %v794_v8 = vpop.eup %793 }
0x1093   :  { %v615_v9 = vmul.f32 %v794_v8, %v613_v7  ;;  %vm620_vm1 = vweird.f32 %v794_v8 }
0x1094   :  { %vm621_vm3 = vmor %vm619_vm2, %vm620_vm1 }
0x1095   :  { %v616_v10 = vsub.f32 1.0, %v615_v9 }
0x1097   :  { %v617_v11 = vmul.f32 %v794_v8, %v616_v10 }
0x1099   :  { %v618_v12 = vadd.f32 %v794_v8, %v617_v11 }
0x109b   :  { %v622_v15 = vsel %vm621_vm3, %v794_v8, %v618_v12 }
0x109c   :  { %v627_v18 = vsel %vm624_vm4, %v626_v16, %v622_v15 }
0x109d   :  { %v630_v20 = vmul.f32 %v627_v18, %v574_v60 }
0x10fa   :  { %v633_v17 = vpop.permute.xlu1 %632 }
0x10fb   :  { %v635_v19 = vmul.f32 %v633_v17, %v627_v18 }
0x10fd   :  { %637 = vrot.lane.b32.xlu2 %v635_v19, %s933_s3 }
0x1157   :  { %v638_v21 = vpop.permute.xlu2 %637 }
0x1158   :  { %v640_v22 = vadd.f32 %v638_v21, %v630_v20 }
0x115a   :  { %795 = vtanh.f32 %v640_v22 }
0x1160   :  { %v796_v23 = vpop.eup %795 }
0x1161   :  { %643 = vrot.lane.b32.xlu0 %v796_v23, %s932_s17 }
0x11d3   :  { %v644_v24 = vpop.permute.xlu0 %643 }
0x11d4   :  { %v646_v25 = vmul.f32 %v644_v24, %v627_v18 }
0x11d6   :  { %648 = vrot.lane.b32.xlu1 %v646_v25, %s933_s3 }
0x1248   :  { %v649_v30 = vpop.permute.xlu1 %648 }
0x1249   :  { %651 = vst.msk [vmem:[#allocation3 + $0x7] sm:$0x1] %vm188_vm5, %v649_v30 }
0x1250   :  { %v652_v31 = vld [vmem:[#allocation3] sm:$0xff] }
0x1251   :  { %720 = vmatmul.msk.f32.vlgmr.msra.gmra.mxu1 %vm122_vm6, %v652_v31 }
0x12ce   :  { %v681_v33 = vpop.f32.mrf.mxu1 }
0x12cf   :  { %v682_v34 = vadd.f32 %v732_v32, %v681_v33 }
0x12d1   :  { %684 = vst [vmem:[#allocation12] sm:$0xff] %v682_v34 }
0x12d2   :  { %695 = dma.vmem_to_hbm [thread:$0]  %s691_s21, 128, %s693_s24, [#allocation6]  }
0x12d3   :  { %923 = dma.done.wait [#allocation6], 128  }
0x12d4   :  { %924 = vsyncadd [#allocation6], 4294967168 }
0x12d5   :  { %700 = vsyncpa [#allocation5], 1 }
0x12d6   :  { %701 = vsyncpa [#allocation8], 1 }
0x12d7   :  { %702 = vsyncpa [#allocation11], 1 }
0x12d8   :  { %703 = vsyncpa [#allocation6], 1 }

</bundles_post_ra>
